<compile_context>
chip_gen: v6e
topology: v6e:2x2x1
jax: 0.10.0
libtpu: 0.0.40
codegen_flags: <defaults>
</compile_context>

<pallas_src>
import functools

import jax
import jax.numpy as jnp
from jax import lax
from jax.experimental import pallas as pl
from jax.experimental.pallas import tpu as pltpu


def _pick_tile(n, cap):
    """Largest multiple-of-8 divisor of n that is <= cap (n itself if n <= cap)."""
    if n <= cap:
        return n
    best = 0
    t = 8
    while t <= cap:
        if n % t == 0:
            best = t
        t += 8
    return best if best else n


def _vmem_limit(est_bytes):
    # Explicit scoped-VMEM limit (>= 32 MiB default, capped at v7x's 64 MiB physical).
    return int(min(max(2 * int(est_bytes), 32 * 1024 * 1024), 64 * 1024 * 1024))


# ----------------------------------------------------------------------------
# Kernel A: fused QKV projection (q pre-scaled by hs^-0.5)
# ----------------------------------------------------------------------------
def qkv_proj_kernel(x_ref, wq_ref, wk_ref, wv_ref, q_ref, k_ref, v_ref, *, scale):
    x = x_ref[0]                                             # (tm, C)
    # Three K=C matmuls instead of one (tm, 3C): only one (tm, C) f32 slab live at a time.
    q = jnp.dot(x, wq_ref[...], preferred_element_type=jnp.float32) * jnp.float32(scale)
    q_ref[0] = q.astype(q_ref.dtype)
    k = jnp.dot(x, wk_ref[...], preferred_element_type=jnp.float32)
    k_ref[0] = k.astype(k_ref.dtype)
    v = jnp.dot(x, wv_ref[...], preferred_element_type=jnp.float32)
    v_ref[0] = v.astype(v_ref.dtype)


# ----------------------------------------------------------------------------
# Kernel B: flash-style causal attention + fused output projection
# ----------------------------------------------------------------------------
def flash_attn_proj_kernel(q_ref, k_ref, v_ref, wp_ref, b_ref, o_ref, *,
                           num_heads, head_size):
    qi = pl.program_id(1)
    tq = q_ref.shape[1]
    C = q_ref.shape[2]
    dt = q_ref.dtype
    H, hs = num_heads, head_size
    kv_tile = tq                                             # kv tiles aligned with q tiles

    q_all = q_ref[0]                                         # (tq, C), pre-scaled
    q_start = qi * tq
    row_ids = q_start + lax.broadcasted_iota(jnp.int32, (tq, kv_tile), 0)
    col_base = lax.broadcasted_iota(jnp.int32, (tq, kv_tile), 1)
    neg_big = jnp.float32(-1e30)

    def kv_step(j, carry):
        m, l, acc = carry                                    # (tq,H), (tq,H), (tq,C) f32
        kv_start = pl.multiple_of(j * kv_tile, kv_tile)
        k_blk = k_ref[0, pl.ds(kv_start, kv_tile), :]        # (tkv, C)
        v_blk = v_ref[0, pl.ds(kv_start, kv_tile), :]        # (tkv, C)
        mask = (kv_start + col_base) <= row_ids              # cheap VPU vs exp
        m_cols, l_cols, acc_cols = [], [], []
        for h in range(H):                                   # static unroll; H is small
            s0 = h * hs
            s = lax.dot_general(q_all[:, s0:s0 + hs], k_blk[:, s0:s0 + hs],
                                (((1,), (1,)), ((), ())),
                                preferred_element_type=jnp.float32)   # (tq, tkv)
            s = jnp.where(mask, s, neg_big)
            m_prev = m[:, h:h + 1]
            m_new = jnp.maximum(m_prev, jnp.max(s, axis=-1, keepdims=True))
            alpha = jnp.exp(m_prev - m_new)
            p = jnp.exp(s - m_new)
            l_cols.append(alpha * l[:, h:h + 1] + jnp.sum(p, axis=-1, keepdims=True))
            acc_cols.append(alpha * acc[:, s0:s0 + hs]
                            + jnp.dot(p.astype(dt), v_blk[:, s0:s0 + hs],
                                      preferred_element_type=jnp.float32))
            m_cols.append(m_new)
        return (jnp.concatenate(m_cols, axis=-1),
                jnp.concatenate(l_cols, axis=-1),
                jnp.concatenate(acc_cols, axis=-1))

    # Causal block skipping: kv blocks entirely above the diagonal are never visited.
    num_kv_blocks = qi + 1
    m0 = jnp.full((tq, H), -jnp.inf, jnp.float32)
    l0 = jnp.zeros((tq, H), jnp.float32)
    a0 = jnp.zeros((tq, C), jnp.float32)
    _, l, acc = lax.fori_loop(0, num_kv_blocks, kv_step, (m0, l0, a0))

    inv_l = pl.reciprocal(l, approx=True)                    # (tq, H), EUP
    heads = jnp.concatenate(
        [(acc[:, h * hs:(h + 1) * hs] * inv_l[:, h:h + 1]).astype(dt) for h in range(H)],
        axis=-1)                                             # (tq, C) lane-concatenated

    # Single K=C output-projection matmul (full MXU depth) + bias.
    y = jnp.dot(heads, wp_ref[...], preferred_element_type=jnp.float32)
    y = y + b_ref[...].astype(jnp.float32)
    o_ref[0] = y.astype(o_ref.dtype)


# ----------------------------------------------------------------------------
# Wrapper
# ----------------------------------------------------------------------------
def multihead_attention(x, wq, wk, wv, w_proj, b_proj):
    """x: (B, T, C); wq/wk/wv: (H, C, hs); w_proj: (C, C) (stored for x @ W); b_proj: (C,)."""
    B, T, C = x.shape
    H, _, hs = wq.shape
    assert H * hs == C
    dt = x.dtype
    itemsize = jnp.dtype(dt).itemsize

    # One-time packing: (H, C, hs) -> lane-concatenated (C, C).
    wq_cat = jnp.transpose(wq, (1, 0, 2)).reshape(C, C)
    wk_cat = jnp.transpose(wk, (1, 0, 2)).reshape(C, C)
    wv_cat = jnp.transpose(wv, (1, 0, 2)).reshape(C, C)
    b2d = b_proj.reshape(1, C)

    # ---- Kernel A: QKV projection ----
    tm = _pick_tile(T, 512)
    assert T % tm == 0
    qkv_est = (2 * 3 * C * C * itemsize          # weights, double-buffered
               + 2 * 4 * tm * C * itemsize       # x + q/k/v blocks, double-buffered
               + 2 * tm * C * 4)                 # f32 intermediates
    q_s, k_s, v_s = pl.pallas_call(
        functools.partial(qkv_proj_kernel, scale=float(hs) ** -0.5),
        out_shape=(jax.ShapeDtypeStruct((B, T, C), dt),) * 3,
        grid=(B, T // tm),
        in_specs=[
            pl.BlockSpec((1, tm, C), lambda b, i: (b, i, 0)),    # x row tile
            pl.BlockSpec((C, C), lambda b, i: (0, 0)),           # Wq (constant -> no re-DMA)
            pl.BlockSpec((C, C), lambda b, i: (0, 0)),           # Wk
            pl.BlockSpec((C, C), lambda b, i: (0, 0)),           # Wv
        ],
        out_specs=(
            pl.BlockSpec((1, tm, C), lambda b, i: (b, i, 0)),
            pl.BlockSpec((1, tm, C), lambda b, i: (b, i, 0)),
            pl.BlockSpec((1, tm, C), lambda b, i: (b, i, 0)),
        ),
        compiler_params=pltpu.CompilerParams(
            dimension_semantics=("parallel", "parallel"),
            vmem_limit_bytes=_vmem_limit(qkv_est)),
    )(x, wq_cat, wk_cat, wv_cat)

    # ---- Kernel B: flash attention + output projection ----
    tq = _pick_tile(T, 256)
    assert T % tq == 0
    attn_est = (2 * (C * C + C) * itemsize                      # W_proj + bias, double-buffered
                + 2 * (2 * tq * C + 2 * T * C) * itemsize       # q/out tiles + resident K/V, x2 buffers
                + 4 * (2 * tq * C + 2 * tq * tq + tq * C))      # f32 acc/heads/score headroom
    out = pl.pallas_call(
        functools.partial(flash_attn_proj_kernel, num_heads=H, head_size=hs),
        out_shape=jax.ShapeDtypeStruct((B, T, C), dt),
        grid=(B, T // tq),
        in_specs=[
            pl.BlockSpec((1, tq, C), lambda b, i: (b, i, 0)),    # q tile (pre-scaled)
            pl.BlockSpec((1, T, C), lambda b, i: (b, 0, 0)),     # K (resident per batch, no re-DMA across q tiles)
            pl.BlockSpec((1, T, C), lambda b, i: (b, 0, 0)),     # V
            pl.BlockSpec((C, C), lambda b, i: (0, 0)),           # W_proj
            pl.BlockSpec((1, C), lambda b, i: (0, 0)),           # bias
        ],
        out_specs=pl.BlockSpec((1, tq, C), lambda b, i: (b, i, 0)),  # lane-dense (tq, C)
        compiler_params=pltpu.CompilerParams(
            dimension_semantics=("parallel", "parallel"),
            vmem_limit_bytes=_vmem_limit(attn_est)),
    )(q_s, k_s, v_s, w_proj, b2d)

    # Dropout: identity in eval mode.
    return out


# ----------------------------------------------------------------------------
# Pure-JAX reference for validation
# ----------------------------------------------------------------------------
def reference(x, wq, wk, wv, w_proj, b_proj):
    B, T, C = x.shape
    H, _, hs = wq.shape
    outs = []
    for h in range(H):
        q = x @ wq[h]
        k = x @ wk[h]
        v = x @ wv[h]
        s = (q @ jnp.swapaxes(k, -1, -2)) * (hs ** -0.5)
        mask = jnp.tril(jnp.ones((T, T), bool))
        s = jnp.where(mask, s, -1e30)
        p = jax.nn.softmax(s, axis=-1)
        outs.append(p @ v)
    cat = jnp.concatenate(outs, axis=-1)
    return cat @ w_proj + b_proj


if __name__ == "__main__":
    B, T, C, H = 2, 8, 32, 4
    hs = C // H

    key = jax.random.PRNGKey(0)
    kx, kq, kk, kv, kw, kb = jax.random.split(key, 6)

    x = jax.random.normal(kx, (B, T, C), dtype=jnp.float32)
    wq = jax.random.normal(kq, (H, C, hs), dtype=jnp.float32) * 0.02
    wk = jax.random.normal(kk, (H, C, hs), dtype=jnp.float32) * 0.02
    wv = jax.random.normal(kv, (H, C, hs), dtype=jnp.float32) * 0.02
    w_proj = jax.random.normal(kw, (C, C), dtype=jnp.float32) * 0.02
    b_proj = jax.random.normal(kb, (C,), dtype=jnp.float32) * 0.02

    out = multihead_attention(x, wq, wk, wv, w_proj, b_proj)
    out = jax.block_until_ready(out)

    ref = reference(x, wq, wk, wv, w_proj, b_proj)
    assert out.shape == (B, T, C)
    # approx=True softmax reciprocal (EUP) -> slightly relaxed tolerance.
    assert jnp.allclose(out, ref, atol=2e-4, rtol=2e-3), "mismatch vs reference"

    print("KERNEL_OK")
</pallas_src>

<mosaic_0001>
module attributes {stable_mosaic.version = 11 : i64} {
  func.func @qkv_proj_kernel(%arg0: i32, %arg1: i32, %arg2: memref<1x8x32xf32, #tpu.memory_space<vmem>>, %arg3: memref<32x32xf32, #tpu.memory_space<vmem>>, %arg4: memref<32x32xf32, #tpu.memory_space<vmem>>, %arg5: memref<32x32xf32, #tpu.memory_space<vmem>>, %arg6: memref<1x8x32xf32, #tpu.memory_space<vmem>>, %arg7: memref<1x8x32xf32, #tpu.memory_space<vmem>>, %arg8: memref<1x8x32xf32, #tpu.memory_space<vmem>>) attributes {dimension_semantics = [#tpu.dimension_semantics<parallel>, #tpu.dimension_semantics<parallel>], iteration_bounds = array<i64: 2, 1>, scalar_prefetch = 0 : i64, scratch_operands = 0 : i64, tpu.core_type = #tpu.core_type<tc>, window_params = [{transform_indices = @transform_0, window_bounds = array<i64: 1, 8, 32>}, {pipeline_mode = #tpu.pipeline_mode<synchronous>, transform_indices = @transform_1, window_bounds = array<i64: 32, 32>}, {pipeline_mode = #tpu.pipeline_mode<synchronous>, transform_indices = @transform_2, window_bounds = array<i64: 32, 32>}, {pipeline_mode = #tpu.pipeline_mode<synchronous>, transform_indices = @transform_3, window_bounds = array<i64: 32, 32>}, {transform_indices = @transform_4, window_bounds = array<i64: 1, 8, 32>}, {transform_indices = @transform_5, window_bounds = array<i64: 1, 8, 32>}, {transform_indices = @transform_6, window_bounds = array<i64: 1, 8, 32>}]} {
    %c0 = arith.constant 0 : index
    %c0_0 = arith.constant 0 : index
    %c0_1 = arith.constant 0 : index
    %0 = vector.load %arg2[%c0, %c0_0, %c0_1] : memref<1x8x32xf32, #tpu.memory_space<vmem>>, vector<1x8x32xf32>
    %1 = vector.shape_cast %0 : vector<1x8x32xf32> to vector<8x32xf32>
    %c0_2 = arith.constant 0 : index
    %c0_3 = arith.constant 0 : index
    %2 = vector.load %arg3[%c0_2, %c0_3] : memref<32x32xf32, #tpu.memory_space<vmem>>, vector<32x32xf32>
    %cst = arith.constant dense<0.000000e+00> : vector<8x32xf32>
    %3 = tpu.matmul %1, %2, %cst {dimension_numbers = #tpu.dot_dimension_numbers<[1], [0], [0], [1], [0, 0, 1, 1], [], []>} : vector<8x32xf32>, vector<32x32xf32>, vector<8x32xf32> -> vector<8x32xf32>
    %cst_4 = arith.constant 0.353553385 : f32
    %4 = vector.broadcast %cst_4 : f32 to vector<8x32xf32>
    %5 = arith.mulf %3, %4 : vector<8x32xf32>
    %c0_5 = arith.constant 0 : index
    %c0_6 = arith.constant 0 : index
    %c0_7 = arith.constant 0 : index
    %6 = vector.load %arg6[%c0_5, %c0_6, %c0_7] : memref<1x8x32xf32, #tpu.memory_space<vmem>>, vector<1x8x32xf32>
    %7 = vector.shape_cast %6 : vector<1x8x32xf32> to vector<8x32xf32>
    %8 = vector.shape_cast %5 : vector<8x32xf32> to vector<1x8x32xf32>
    tpu.vector_store %arg6[%c0_5, %c0_6, %c0_7], %8 {strides = array<i32>} : memref<1x8x32xf32, #tpu.memory_space<vmem>>, vector<1x8x32xf32>,
    %c0_8 = arith.constant 0 : index
    %c0_9 = arith.constant 0 : index
    %9 = vector.load %arg4[%c0_8, %c0_9] : memref<32x32xf32, #tpu.memory_space<vmem>>, vector<32x32xf32>
    %cst_10 = arith.constant dense<0.000000e+00> : vector<8x32xf32>
    %10 = tpu.matmul %1, %9, %cst_10 {dimension_numbers = #tpu.dot_dimension_numbers<[1], [0], [0], [1], [0, 0, 1, 1], [], []>} : vector<8x32xf32>, vector<32x32xf32>, vector<8x32xf32> -> vector<8x32xf32>
    %c0_11 = arith.constant 0 : index
    %c0_12 = arith.constant 0 : index
    %c0_13 = arith.constant 0 : index
    %11 = vector.load %arg7[%c0_11, %c0_12, %c0_13] : memref<1x8x32xf32, #tpu.memory_space<vmem>>, vector<1x8x32xf32>
    %12 = vector.shape_cast %11 : vector<1x8x32xf32> to vector<8x32xf32>
    %13 = vector.shape_cast %10 : vector<8x32xf32> to vector<1x8x32xf32>
    tpu.vector_store %arg7[%c0_11, %c0_12, %c0_13], %13 {strides = array<i32>} : memref<1x8x32xf32, #tpu.memory_space<vmem>>, vector<1x8x32xf32>,
    %c0_14 = arith.constant 0 : index
    %c0_15 = arith.constant 0 : index
    %14 = vector.load %arg5[%c0_14, %c0_15] : memref<32x32xf32, #tpu.memory_space<vmem>>, vector<32x32xf32>
    %cst_16 = arith.constant dense<0.000000e+00> : vector<8x32xf32>
    %15 = tpu.matmul %1, %14, %cst_16 {dimension_numbers = #tpu.dot_dimension_numbers<[1], [0], [0], [1], [0, 0, 1, 1], [], []>} : vector<8x32xf32>, vector<32x32xf32>, vector<8x32xf32> -> vector<8x32xf32>
    %c0_17 = arith.constant 0 : index
    %c0_18 = arith.constant 0 : index
    %c0_19 = arith.constant 0 : index
    %16 = vector.load %arg8[%c0_17, %c0_18, %c0_19] : memref<1x8x32xf32, #tpu.memory_space<vmem>>, vector<1x8x32xf32>
    %17 = vector.shape_cast %16 : vector<1x8x32xf32> to vector<8x32xf32>
    %18 = vector.shape_cast %15 : vector<8x32xf32> to vector<1x8x32xf32>
    tpu.vector_store %arg8[%c0_17, %c0_18, %c0_19], %18 {strides = array<i32>} : memref<1x8x32xf32, #tpu.memory_space<vmem>>, vector<1x8x32xf32>,
    return
  }
  func.func @transform_0(%arg0: i32, %arg1: i32) -> (i32, i32, i32) {
    %c0_i32 = arith.constant 0 : i32
    %c0_i32_0 = arith.constant 0 : i32
    return %arg0, %arg1, %c0_i32 : i32, i32, i32
  }
  func.func @transform_1(%arg0: i32, %arg1: i32) -> (i32, i32) {
    %c0_i32 = arith.constant 0 : i32
    %c0_i32_0 = arith.constant 0 : i32
    %c0_i32_1 = arith.constant 0 : i32
    return %c0_i32, %c0_i32_0 : i32, i32
  }
  func.func @transform_2(%arg0: i32, %arg1: i32) -> (i32, i32) {
    %c0_i32 = arith.constant 0 : i32
    %c0_i32_0 = arith.constant 0 : i32
    %c0_i32_1 = arith.constant 0 : i32
    return %c0_i32, %c0_i32_0 : i32, i32
  }
  func.func @transform_3(%arg0: i32, %arg1: i32) -> (i32, i32) {
    %c0_i32 = arith.constant 0 : i32
    %c0_i32_0 = arith.constant 0 : i32
    %c0_i32_1 = arith.constant 0 : i32
    return %c0_i32, %c0_i32_0 : i32, i32
  }
  func.func @transform_4(%arg0: i32, %arg1: i32) -> (i32, i32, i32) {
    %c0_i32 = arith.constant 0 : i32
    %c0_i32_0 = arith.constant 0 : i32
    return %arg0, %arg1, %c0_i32 : i32, i32, i32
  }
  func.func @transform_5(%arg0: i32, %arg1: i32) -> (i32, i32, i32) {
    %c0_i32 = arith.constant 0 : i32
    %c0_i32_0 = arith.constant 0 : i32
    return %arg0, %arg1, %c0_i32 : i32, i32, i32
  }
  func.func @transform_6(%arg0: i32, %arg1: i32) -> (i32, i32, i32) {
    %c0_i32 = arith.constant 0 : i32
    %c0_i32_0 = arith.constant 0 : i32
    return %arg0, %arg1, %c0_i32 : i32, i32, i32
  }
}

</mosaic_0001>

<bundles_post_ra>
// kernel: tpu_custom_call.1
= control target key start
LH: loop header
LB: loop body
LE: loop exit
PB: predicated region body
PF: predicated region fallthrough
CT: control target
= control target key end

     0   :  { %s1565_s0 = inlined_call_operand.hbm [shape: f32[2,8,32], index: 0, kind: input, shape index: {}]   ;;  %s1566_s1 = inlined_call_operand.hbm [shape: f32[32,32], index: 1, kind: input, shape index: {}]   ;;  %s1567_s2 = inlined_call_operand.hbm [shape: f32[32,32], index: 2, kind: input, shape index: {}]   ;;  %s1568_s3 = inlined_call_operand.hbm [shape: f32[32,32], index: 3, kind: input, shape index: {}]   ;;  %s1569_s4 = inlined_call_operand.hbm [shape: f32[2,8,32], index: 4, kind: output, shape index: {0}]   ;;  %s1570_s5 = inlined_call_operand.hbm [shape: f32[2,8,32], index: 5, kind: output, shape index: {1}]   ;;  %s1571_s6 = inlined_call_operand.hbm [shape: f32[2,8,32], index: 6, kind: output, shape index: {2}]  }
   0x1   :  { %1576 = sst [smem:[#allocation19_spill]] %s1565_s0 }
   0x2   :  { %1577 = sst [smem:[#allocation20_spill]] %s1566_s1 }
   0x3   :  { %1578 = sst [smem:[#allocation21_spill]] %s1567_s2 }
   0x4   :  { %12 = vsyncpa [#allocation3], 0 }
   0x5   :  { %14 = vsyncpa [#allocation3 + $0x1], 0 }
   0x6   :  { %15 = vsyncpa [#allocation6], 0 }
   0x7   :  { %16 = vsyncpa [#allocation9], 0 }
   0x8   :  { %17 = vsyncpa [#allocation4], 0 }
   0x9   :  { %19 = vsyncpa [#allocation4 + $0x1], 0 }
   0xa   :  { %20 = vsyncpa [#allocation12], 0 }
   0xb   :  { %22 = vsyncpa [#allocation12 + $0x1], 0  ;;  %s1287_s21 = smov 0   ;;  %s1289_s22 = smov 0  }
   0xc   :  { %s1291_s23 = smov 0   ;;  %s1293_s24 = smov 0  }
   0xd   :  { %s1295_s25 = smov 0   ;;  %s1297_s26 = smov 0  }
   0xe LB: > { %s1318_s27 = sadd.s32 4294967295, %s1239_s26   ;;  %s1574_s28 = sadd.s32 4294967294, %s1239_s26   ;;  %s1239_s26 = sphi %s1297_s26, %s28_s26   ;;  %s1235_s25 = sphi %s1295_s25, %s1602_s25   ;;  %s1231_s24 = sphi %s1293_s24, %s1601_s24   ;;  %s1227_s23 = sphi %s1291_s23, %s1600_s23   ;;  %s1223_s22 = sphi %s1289_s22, %s1599_s22   ;;  %s1219_s21 = sphi %s1287_s21, %s1598_s21  }
   0xf   : > { %p62_p0 = scmp.ne.s32.totalorder %s1223_s22, %s1219_s21  ;;  %p1572_p1 = scmp.eq.s32.totalorder %s1318_s27, 0 }
  0x10   : > { %p157_p3 = scmp.eq.s32.totalorder %s1574_s28, 1  ;;  %p808_p5 = scmp.ge.s32.totalorder %s1239_s26, 1 }
  0x11   : > { %p1329_p4 = por %p1572_p1, %p62_p0  ;;  %p220_p7 = scmp.lt.s32.totalorder %s1239_s26, 3 }
  0x12   : > { %p1334_p6 = por %p157_p3, %p62_p0  ;;  %s1241_s8 = smov [#allocation5]  }
  0x13   : > { %s1579_s29 = scalar_select %p1329_p4, 1, 0 }
  0x14   : > { %s1580_s30 = scalar_select %p1334_p6, 1, 0 }
  0x15   : > { %p1339_p8 = pnand %p808_p5, %p220_p7  ;;  %s232_s9 = sshll.u32 %s1241_s8, 4  ;;  %s233_s9 = int_to_ptr.vmem [resolvable:$true] %s232_s9 }
  0x16   : > { %s1242_s11 = smov [#allocation7]   ;;  %s1243_s13 = smov [#allocation8]  }
  0x17   : > { %p902_p9 = pneg %p1339_p8  ;;  %s245_s12 = sshll.u32 %s1242_s11, 4  ;;  %s246_s12 = int_to_ptr.vmem [resolvable:$true] %s245_s12 }
  0x18   : > { %s258_s14 = sshll.u32 %s1243_s13, 4  ;;  %s1000_s15 = scalar_lea.vmem %s233_s9, 512  ;;  %s259_s14 = int_to_ptr.vmem [resolvable:$true] %s258_s14 }
  0x19   : > { %p1348_p11 = pnand %p902_p9, %p1572_p1  ;;  %p1001_p13 = scmp.ne.s32.totalorder %s233_s9, %s1000_s15 }
  0x1a   : > { %p1008_p5 = scmp.lt.s32.totalorder %s233_s9, %s233_s9  ;;  %p1009_p7 = scmp.lt.s32.totalorder %s1000_s15, %s1000_s15 }
  0x1b   : > { %p991_p12 = pneg %p1348_p11 }
  0x1c   : > { %p1010_p9 = por %p1009_p7, %p1008_p5 }
  0x1d   : > { %p1003_p0 = pnand %p1001_p13, %p991_p12 }
  0x1f   : > { %p1004_p3 = pneg %p1003_p0 }
  0x21   : > { %p1011_p10 = pnand %p1010_p9, %p1004_p3 }
  0x23   : > { %1014 = shalt.err (!%p1011_p10)
}
  0x24   : > { %s1244_s16 = smov 128   ;;  %s1245_s17 = smov 8  }
  0x25   : > { %s1583_s1 = sld [smem:[#allocation20_spill]]  ;;  %s1026_s20 = scalar_lea.vmem %s246_s12, 512 }
  0x26   : > { %p1027_p1 = scmp.ne.s32.totalorder %s246_s12, %s1026_s20  ;;  %p1034_p2 = scmp.lt.s32.totalorder %s246_s12, %s246_s12 }
  0x27   : > { %p1035_p6 = scmp.lt.s32.totalorder %s1026_s20, %s1026_s20 }
  0x28   : > { %p1029_p13 = pnand %p1027_p1, %p991_p12 }
  0x29   : > { %p1036_p5 = por %p1035_p6, %p1034_p2 }
  0x2a   : > { %p1030_p0 = pneg %p1029_p13 }
  0x2b   : > { %905 = dma.hbm_to_vmem [thread:$0]  (!%p1348_p11), %s1583_s1, 512, %s233_s9, [#allocation6], %s1244_s16, %s1244_s16, %s1245_s17  }
  0x2c   : > { %p1037_p3 = pnand %p1036_p5, %p1030_p0 }
  0x2e   : > { %1040 = shalt.err (!%p1037_p3)
}
  0x2f   : > { %s1584_s2 = sld [smem:[#allocation21_spill]]  ;;  %s1052_s9 = scalar_lea.vmem %s259_s14, 512 }
  0x30   : > { %p1053_p10 = scmp.ne.s32.totalorder %s259_s14, %s1052_s9  ;;  %p1060_p9 = scmp.lt.s32.totalorder %s259_s14, %s259_s14 }
  0x31   : > { %p1061_p13 = scmp.lt.s32.totalorder %s1052_s9, %s1052_s9 }
  0x32   : > { %p1055_p7 = pnand %p1053_p10, %p991_p12 }
  0x33   : > { %p1062_p4 = por %p1061_p13, %p1060_p9 }
  0x34   : > { %p1056_p1 = pneg %p1055_p7 }
  0x35   : > { %908 = dma.hbm_to_vmem [thread:$0]  (!%p1348_p11), %s1584_s2, 512, %s246_s12, [#allocation6], %s1244_s16, %s1244_s16, %s1245_s17  }
  0x36   : > { %p1063_p2 = pnand %p1062_p4, %p1056_p1 }
  0x38   : > { %1066 = shalt.err (!%p1063_p2)
}
  0x39   : > { %911 = dma.hbm_to_vmem [thread:$0]  (!%p1348_p11), %s1568_s3, 512, %s259_s14, [#allocation9], %s1244_s16, %s1244_s16, %s1245_s17  }
  0x3a   : > { %s49_s12 = sadd.s32 1, %s1227_s23  ;;  %s40_s18 = sadd.s32 1, %s1235_s25 }
  0x3b   : > { %p56_p4 = scmp.ne.s32.totalorder %s1227_s23, %s1223_s22  ;;  %p42_p6 = scmp.ge.s32.totalorder %s40_s18, 2 }
  0x3c   : > { %p57_p12 = scmp.eq.s32.totalorder %s1239_s26, 0  ;;  %p1585_p0 = scmp.eq.s32.totalorder %s1318_s27, 1 }
  0x3d   : > { %p929_p3 = scmp.lt.s32.totalorder %s1239_s26, 2  ;;  %s1604_s18 = smov (%p42_p6, %s40_s18), 0 }
  0x3e   : > { %p1385_p5 = por %p1585_p0, %p56_p4  ;;  %p58_p10 = por %p57_p12, %p56_p4 }
  0x3f   : > { %s272_s19 = sand.u32 1, %s1227_s23   ;;  %s44_s20 = ssub.s32 %s1235_s25, %s1604_s18 }
  0x40   : > { %p47_p7 = scmp.eq.s32.totalorder %s44_s20, 0  ;;  %s813_s14 = sshll.u32 %s272_s19, 3 }
  0x41   : > { %s814_s16 = sshll.u32 %s1235_s25, 7  ;;  %s1587_s0 = sld [smem:[#allocation19_spill]] }
  0x42   : > { %s1397_s17 = scalar_select %p47_p7, %s1227_s23, %s49_s12  }
  0x43   : > { %s276_s13 = scalar_lea.vmem [#allocation2], %s813_s14  ;;  %p1404_p11 = pnand %p929_p3, %p58_p10 }
  0x44   : > { %s284_s15 = sshll.u32 %s276_s13, 4  ;;  %s273_s1 = scalar_lea.sflag [#allocation3], %s272_s19  ;;  %s285_s15 = int_to_ptr.vmem [resolvable:$true] %s284_s15 }
  0x45   : > { %p1069_p1 = pneg %p1404_p11  ;;  %s1080_s20 = scalar_lea.vmem %s285_s15, 128 }
  0x46   : > { %p1081_p9 = scmp.ne.s32.totalorder %s285_s15, %s1080_s20  ;;  %s1246_s12 = smov [#allocation2]  }
  0x47   : > { %s282_s9 = scalar_lea.hbm %s1587_s0, %s814_s16  ;;  %s1085_s2 = sshll.u32 %s1246_s12, 4  ;;  %s1086_s2 = int_to_ptr.vmem [resolvable:$false] %s1085_s2 }
  0x48   : > { %p1083_p13 = pnand %p1081_p9, %p1069_p1  ;;  %s1087_s16 = scalar_lea.vmem %s1086_s2, 256 }
  0x49   : > { %p1088_p4 = scmp.lt.s32.totalorder %s285_s15, %s1086_s2  ;;  %p1089_p6 = scmp.lt.s32.totalorder %s1087_s16, %s1080_s20 }
  0x4a   : > { %p1084_p2 = pneg %p1083_p13 }
  0x4b   : > { %p1090_p12 = por %p1089_p6, %p1088_p4 }
  0x4d   : > { %p1091_p0 = pnand %p1090_p12, %p1084_p2 }
  0x4f   : > { %1094 = shalt.err (!%p1091_p0)
}
  0x50   : > { %915 = dma.hbm_to_vmem [thread:$0]  (!%p1404_p11), %s282_s9, 128, %s285_s15, %s273_s1  }
  0x51   : > { %293 = sbr.rel (%p1339_p8) target bundleno = 356 (0x164), region = 36  ;;  %s1415_s19 = sand.u32 (!%p1339_p8), 1, %s1223_s22  }
  0x52   : > { %s1418_s14 = sshll.u32 (!%p1339_p8), %s1415_s19, 3  ;;  %s296_s2 = scalar_lea.sflag (!%p1339_p8), [#allocation3], %s1415_s19 }
  0x53   : > { %s299_s8 = scalar_lea.vmem (!%p1339_p8), [#allocation2], %s1418_s14  ;;  %p1589_p3 = scmp.ne.s32.totalorder (!%p1339_p8), %s1579_s29, 0 }
  0x56   : > { %1198 = dma.done.wait (%p1589_p3), %s296_s2, 128  }
  0x57   : > { %1200 = vsyncadd (%p1589_p3), %s296_s2, 4294967168  ;;  %p1590_p10 = scmp.eq.s32.totalorder %s1318_s27, 0 }
  0x59   : > { %1202 = dma.done.wait (%p1590_p10), [#allocation6], 1024   ;;  %p1591_p8 = pmov %p1590_p10 }
  0x5b   : > { %1204 = vsyncadd (%p1591_p8), [#allocation6], 4294966272  ;;  %p1592_p7 = pmov %p1591_p8 }
  0x5d   : > { %1206 = dma.done.wait (%p1592_p7), [#allocation9], 512   ;;  %p1593_p11 = pmov %p1592_p7 }
  0x5e   : > { %v1247_v0 = vmov 0.0   ;;  %vm1248_vm0 = vmmov 0   ;;  %v354_v1 = vld [vmem:[#allocation5 + $0x18] sm:$0xff]  ;;  %v353_v2 = vld [vmem:[#allocation5 + $0x10] sm:$0xff]  ;;  %v352_v4 = vld [vmem:[#allocation5 + $0x8] sm:$0xff]  ;;  %vm355_vm1 = vcmask 261120  }
  0x5f   : > { %1208 = vsyncadd (%p1593_p11), [#allocation9], 4294966784  ;;  %849 = vmatprep.subr.mxu0 %v1247_v0  ;;  %860 = vmatprep.subr.mxu1 %v1247_v0  ;;  %v434_v3 = vld [vmem:[#allocation7 + $0x18] sm:$0xff]  ;;  %v433_v5 = vld [vmem:[#allocation7 + $0x10] sm:$0xff]  ;;  %s586_s1 = sand.u32 1, %s1318_s27   ;;  %s1442_s28 = sshll.u32 %s1231_s24, 7 }
  0x60   : > { %857 = vmatprep.mubr.msk.f32.mxu0 %vm1248_vm0, %v1247_v0  ;;  %868 = vmatprep.mubr.msk.f32.mxu1 %vm1248_vm0, %v1247_v0  ;;  %v432_v6 = vld [vmem:[#allocation7 + $0x8] sm:$0xff]  ;;  %v351_v7 = vld [vmem:[#allocation5] sm:$0xff]  ;;  %v350_v8 = vld [vmem:[%s299_s8] sm:$0xff]  ;;  %s342_s29 = scalar_lea.vmem [#allocation11], %s1418_s14  ;;  %s335_s11 = scalar_lea.vmem [#allocation10], %s1418_s14 }
  0x61   : > { %850 = vmatpush3.msra.mxu0 %v354_v1  ;;  %861 = vmatpush3.msra.mxu1 %v434_v3  ;;  %v509_v9 = vld [vmem:[#allocation8 + $0x18] sm:$0xff]  ;;  %v431_v10 = vld [vmem:[#allocation7] sm:$0xff]  ;;  %v508_v11 = vld [vmem:[#allocation8 + $0x10] sm:$0xff]  ;;  %s620_s7 = sshll.u32 %s342_s29, 4  ;;  %s606_s9 = sshll.u32 %s335_s11, 4  ;;  %s1452_s7 = int_to_ptr.vmem [resolvable:$true] %s620_s7  ;;  %s1460_s9 = int_to_ptr.vmem [resolvable:$true] %s606_s9 }
  0x62   : > { %851 = vmatprep.subr.mxu0 %v1247_v0  ;;  %862 = vmatprep.subr.mxu1 %v1247_v0  ;;  %v507_v12 = vld [vmem:[#allocation8 + $0x8] sm:$0xff]  ;;  %v506_v13 = vld [vmem:[#allocation8] sm:$0xff]  ;;  %s1450_s20 = scalar_lea.hbm %s1570_s5, %s1442_s28  ;;  %s1458_s12 = scalar_lea.hbm %s1569_s4, %s1442_s28 }
  0x63   : > { %852 = vmatpush3.msra.mxu0 %v353_v2  ;;  %863 = vmatpush3.msra.mxu1 %v433_v5  ;;  %s1575_s16 = scalar_lea.vmem [#allocation13], %s1418_s14  ;;  %s1469_s8 = scalar_lea.sflag [#allocation12], %s586_s1 }
  0x64   : > { %853 = vmatprep.subr.mxu0 %v1247_v0  ;;  %864 = vmatprep.subr.mxu1 %v1247_v0  ;;  %s1466_s2 = sshll.u32 %s1575_s16, 4  ;;  %s1095_s13 = scalar_lea.vmem %s1452_s7, 128  ;;  %s635_s2 = int_to_ptr.vmem [resolvable:$true] %s1466_s2 }
  0x65   : > { %854 = vmatpush3.msra.mxu0 %v352_v4  ;;  %865 = vmatpush3.msra.mxu1 %v432_v6  ;;  %p1096_p1 = scmp.ne.s32.totalorder %s1452_s7, %s1095_s13  ;;  %s1249_s15 = smov [#allocation11]  }
  0x66   : > { %855 = vmatprep.subr.mxu0 %v1247_v0  ;;  %866 = vmatprep.subr.mxu1 %v1247_v0  ;;  %s1099_s24 = sshll.u32 %s1249_s15, 4  ;;  %s1100_s24 = int_to_ptr.vmem [resolvable:$false] %s1099_s24 }
  0x67   : > { %856 = vmatpush3.msra.mxu0 %v351_v7  ;;  %867 = vmatpush3.msra.mxu1 %v431_v10  ;;  %p1097_p9 = pnand %p1096_p1, %p1385_p5  ;;  %s1101_s27 = scalar_lea.vmem %s1100_s24, 256 }
  0x68   : > { %858 = vmatmul.mubr.msk.f32.vlgmr.msra.gmra.mxu0 %vm355_vm1, %v350_v8  ;;  %871 = vmatprep.subr.mxu0 %v1247_v0  ;;  %p1102_p2 = scmp.lt.s32.totalorder %s1452_s7, %s1100_s24  ;;  %p1103_p4 = scmp.lt.s32.totalorder %s1101_s27, %s1095_s13 }
  0x69   : > { %872 = vmatpush3.msra.mxu0 %v509_v9  ;;  %869 = vmatmul.mubr.msk.f32.vlgmr.msra.gmra.mxu1 %vm355_vm1, %v350_v8  ;;  %p1098_p13 = pneg %p1097_p9 }
  0x6a   : > { %873 = vmatprep.subr.mxu0 %v1247_v0  ;;  %879 = vmatprep.mubr.msk.f32.mxu0 %vm1248_vm0, %v1247_v0  ;;  %p1104_p6 = por %p1103_p4, %p1102_p2 }
  0x6b   : > { %874 = vmatpush3.msra.mxu0 %v508_v11 }
  0x6c   : > { %875 = vmatprep.subr.mxu0 %v1247_v0  ;;  %p1105_p12 = pnand %p1104_p6, %p1098_p13 }
  0x6d   : > { %876 = vmatpush3.msra.mxu0 %v507_v12 }
  0x6e   : > { %877 = vmatprep.subr.mxu0 %v1247_v0 }
  0x6f   : > { %878 = vmatpush3.msra.mxu0 %v506_v13 }
  0x70   : > { %880 = vmatmul.mubr.msk.f32.vlgmr.msra.gmra.mxu0 %vm355_vm1, %v350_v8 }
 0x128   : > { %v425_v14 = vpop.f32.mrf.mxu0 }
 0x129   : > { %v429_v15 = vmul.f32 0.35355338, %v425_v14  ;;  %v501_v17 = vpop.f32.mrf.mxu1 }
 0x12a   : > { %v859_v16 = vpop.f32.mrf.mxu0  ;;  %505 = vst.msk [vmem:[%s342_s29] sm:$0xff] %vm355_vm1, %v501_v17 }
 0x12b   : > { %430 = vst.msk [vmem:[%s335_s11] sm:$0xff] %vm355_vm1, %v429_v15  ;;  %v870_v18 = vpop.f32.mrf.mxu1 }
 0x12c   : > { %1108 = shalt.err (!%p1105_p12)
}
 0x12d   : > { %s1109_s1 = scalar_lea.hbm %s1450_s20, 128  ;;  %s1113_s15 = scalar_lea.hbm %s1570_s5, 256 }
 0x12e   : > { %p1110_p0 = scmp.ne.s32.totalorder %s1450_s20, %s1109_s1  ;;  %p1114_p8 = scmp.lt.s32.totalorder %s1450_s20, %s1570_s5 }
 0x12f   : > { %p1115_p7 = scmp.lt.s32.totalorder %s1113_s15, %s1109_s1 }
 0x130   : > { %p1111_p3 = pnand %p1110_p0, %p1385_p5 }
 0x131   : > { %p1116_p11 = por %p1115_p7, %p1114_p8 }
 0x132   : > { %p1112_p10 = pneg %p1111_p3 }
 0x134   : > { %p1117_p1 = pnand %p1116_p11, %p1112_p10 }
 0x136   : > { %1120 = shalt.err (!%p1117_p1)
}
 0x137   : > { %897 = dma.vmem_to_hbm [thread:$0]  (%p1385_p5), %s1452_s7, 128, %s1450_s20, %s1469_s8  }
 0x138   : > { %s582_s13 = scalar_lea.sflag [#allocation4], %s1415_s19  ;;  %s1121_s24 = scalar_lea.vmem %s1460_s9, 128 }
 0x139   : > { %p1122_p9 = scmp.ne.s32.totalorder %s1460_s9, %s1121_s24  ;;  %s1250_s0 = smov [#allocation10]  }
 0x13a   : > { %s1125_s16 = sshll.u32 %s1250_s0, 4  ;;  %s1126_s16 = int_to_ptr.vmem [resolvable:$false] %s1125_s16 }
 0x13b   : > { %p1123_p13 = pnand %p1122_p9, %p1385_p5  ;;  %s1127_s27 = scalar_lea.vmem %s1126_s16, 256 }
 0x13c   : > { %p1128_p4 = scmp.lt.s32.totalorder %s1460_s9, %s1126_s16  ;;  %p1129_p6 = scmp.lt.s32.totalorder %s1127_s27, %s1121_s24 }
 0x13d   : > { %p1124_p2 = pneg %p1123_p13 }
 0x13e   : > { %p1130_p12 = por %p1129_p6, %p1128_p4 }
 0x140   : > { %p1131_p0 = pnand %p1130_p12, %p1124_p2 }
 0x142   : > { %1134 = shalt.err (!%p1131_p0)
}
 0x143   : > { %s1135_s7 = scalar_lea.hbm %s1458_s12, 128  ;;  %s1139_s1 = scalar_lea.hbm %s1569_s4, 256 }
 0x144   : > { %p1136_p3 = scmp.ne.s32.totalorder %s1458_s12, %s1135_s7  ;;  %p1140_p7 = scmp.lt.s32.totalorder %s1458_s12, %s1569_s4 }
 0x145   : > { %p1141_p11 = scmp.lt.s32.totalorder %s1139_s1, %s1135_s7 }
 0x146   : > { %p1137_p10 = pnand %p1136_p3, %p1385_p5 }
 0x147   : > { %p1142_p1 = por %p1141_p11, %p1140_p7 }
 0x148   : > { %p1138_p8 = pneg %p1137_p10 }
 0x14a   : > { %p1143_p9 = pnand %p1142_p1, %p1138_p8 }
 0x14c   : > { %1146 = shalt.err (!%p1143_p9)
}
 0x14d   : > { %896 = dma.vmem_to_hbm [thread:$0]  (%p1385_p5), %s1460_s9, 128, %s1458_s12, %s582_s13   ;;  %v576_v19 = vpop.f32.mrf.mxu0 }
 0x14e   : > { %s1517_s0 = scalar_lea.hbm %s1571_s6, %s1442_s28  ;;  %s1594_s16 = scalar_lea.vmem [#allocation13], %s1418_s14 }
 0x14f   : > { %580 = vst.msk [vmem:[%s1594_s16] sm:$0xff] %vm355_vm1, %v576_v19  ;;  %v881_v20 = vpop.f32.mrf.mxu0  ;;  %s1147_s27 = scalar_lea.vmem %s635_s2, 128  ;;  %s1251_s7 = smov [#allocation13]  }
 0x150   : > { %p1148_p13 = scmp.ne.s32.totalorder %s635_s2, %s1147_s27  ;;  %s1151_s19 = sshll.u32 %s1251_s7, 4  ;;  %s1152_s19 = int_to_ptr.vmem [resolvable:$false] %s1151_s19 }
 0x151   : > { %s1153_s9 = scalar_lea.vmem %s1152_s19, 256  ;;  %p1154_p6 = scmp.lt.s32.totalorder %s635_s2, %s1152_s19 }
 0x152   : > { %p1149_p2 = pnand %p1148_p13, %p1385_p5  ;;  %p1155_p12 = scmp.lt.s32.totalorder %s1153_s9, %s1147_s27 }
 0x154   : > { %p1150_p4 = pneg %p1149_p2  ;;  %p1156_p0 = por %p1155_p12, %p1154_p6 }
 0x156   : > { %p1157_p3 = pnand %p1156_p0, %p1150_p4 }
 0x158   : > { %1160 = shalt.err (!%p1157_p3)
}
 0x159   : > { %s1161_s14 = scalar_lea.hbm %s1517_s0, 128  ;;  %s1165_s13 = scalar_lea.hbm %s1571_s6, 256 }
 0x15a   : > { %p1162_p10 = scmp.ne.s32.totalorder %s1517_s0, %s1161_s14  ;;  %p1166_p11 = scmp.lt.s32.totalorder %s1517_s0, %s1571_s6 }
 0x15b   : > { %p1167_p1 = scmp.lt.s32.totalorder %s1165_s13, %s1161_s14 }
 0x15c   : > { %p1163_p8 = pnand %p1162_p10, %p1385_p5 }
 0x15d   : > { %p1168_p9 = por %p1167_p1, %p1166_p11 }
 0x15e   : > { %p1164_p7 = pneg %p1163_p8 }
 0x160   : > { %p1169_p13 = pnand %p1168_p9, %p1164_p7 }
 0x162   : > { %1172 = shalt.err (!%p1169_p13)
}
 0x163   : > { %898 = dma.vmem_to_hbm [thread:$0]  (%p1385_p5), %s635_s2, 128, %s1517_s0, %s1469_s8  }
 0x164 PF: > { %s646_s29 = sand.u32 1, %s1219_s21   ;;  %p1595_p2 = scmp.ne.s32.totalorder %s1580_s30, 0 }
 0x165   : > { %p1596_p4 = scmp.ge.s32.totalorder %s1239_s26, 2  ;;  %s647_s11 = scalar_lea.sflag [#allocation4], %s646_s29 }
 0x167   : > { %p917_p6 = pnand %p1596_p4, %p1595_p2 }
 0x169   : > { %p918_p12 = pneg %p917_p6 }
 0x16b   : > { %1210 = dma.done.wait (%p918_p12), %s647_s11, 128  }
 0x16c   : > { %1212 = vsyncadd (%p918_p12), %s647_s11, 4294967168  ;;  %s1597_s15 = sadd.s32 4294967294, %s1239_s26  }
 0x16d   : > { %s655_s24 = sand.u32 1, %s1597_s15  }
 0x16e   : > { %s656_s16 = scalar_lea.sflag [#allocation12], %s655_s24 }
 0x16f   : > { %1214 = dma.done.wait (%p918_p12), %s656_s16, 256  }
 0x170   : > { %1216 = vsyncadd (%p918_p12), %s656_s16, 4294967040  ;;  %s28_s26 = sadd.s32 1, %s1239_s26   ;;  %s1598_s21 = smov %s1223_s22 }
 0x171   : > { %p25_p5 = scmp.ge.s32.totalorder %s28_s26, 4   ;;  %s1599_s22 = smov %s1227_s23 }
 0x172   : > { %s1600_s23 = smov %s1397_s17  ;;  %s1601_s24 = smov %s1235_s25 }
 0x173   : > { %s1602_s25 = smov %s1604_s18  ;;  %27 = sbr.rel (!%p25_p5) target bundleno = 14 (0xe), region = 125 }
 0x178   :  { %670 = vsyncpa [#allocation3], 1 }
 0x179   :  { %672 = vsyncpa [#allocation3 + $0x1], 1 }
 0x17a   :  { %673 = vsyncpa [#allocation6], 1 }
 0x17b   :  { %674 = vsyncpa [#allocation9], 1 }
 0x17c   :  { %675 = vsyncpa [#allocation4], 1 }
 0x17d   :  { %677 = vsyncpa [#allocation4 + $0x1], 1 }
 0x17e   :  { %678 = vsyncpa [#allocation12], 1 }
 0x17f   :  { %680 = vsyncpa [#allocation12 + $0x1], 1 }

</bundles_post_ra>
